<compile_context>
chip_gen: v7x
topology: tpu7x:2x2x1
jax: 0.10.0
libtpu: 0.0.40
codegen_flags: <defaults>
</compile_context>

<pallas_src>
import functools

import jax
import jax.numpy as jnp
from jax.experimental import pallas as pl
from jax.experimental.pallas import tpu as pltpu


def _round_up(v, m):
    return ((v + m - 1) // m) * m


def _relu_conv_kernel(x_ref, w_ref, o_ref, *, stride):
    # x_ref: (N, Hp_pad, Lp)        f32, reflect-padded input, W*C folded on lanes
    # w_ref: (KH, Lp, W_out*C_out)  bf16, precomputed width-Toeplitz conv weight
    # o_ref: (N, H_out, W_out*C_out) f32, lane-dense output
    N, H_out, Ncols = o_ref.shape
    KH, Lp, _ = w_ref.shape

    acc = jnp.zeros((N * H_out, Ncols), jnp.float32)

    if stride == 1:
        # One ReLU over the whole tile (VPU), contiguous sublane slices per tap.
        x = jnp.maximum(x_ref[...], 0.0)
        for kh in range(KH):                              # static, tiny loop
            rows = x[:, kh:kh + H_out, :]                 # (N, H_out, Lp)
            rows = rows.reshape(N * H_out, Lp).astype(jnp.bfloat16)
            # K = Lp = 128 per tap: native MXU contraction width, f32 accumulate.
            acc = acc + jnp.dot(rows, w_ref[kh],
                                preferred_element_type=jnp.float32)
    else:
        # Strided VMEM load per tap (load unit) instead of strided value slice
        # (XLU); ReLU applied per piece.
        for kh in range(KH):
            rows = x_ref[:, pl.ds(kh, H_out, stride=stride), :]
            rows = jnp.maximum(rows, 0.0)
            rows = rows.reshape(N * H_out, Lp).astype(jnp.bfloat16)
            acc = acc + jnp.dot(rows, w_ref[kh],
                                preferred_element_type=jnp.float32)

    o_ref[...] = acc.reshape(o_ref.shape).astype(o_ref.dtype)


def prepare_toeplitz_weight(weight_oihw, *, W_in, stride, padding,
                            dtype=jnp.bfloat16):
    """One-time (per weight) expansion into a width-Toeplitz bf16 slab.

    Returns w_toep of shape (KH, Lp, W_out*C_out) with
      w_toep[kh, wp*C_in + ci, wo*C_out + co] = weight[co, ci, kh, wp - wo*stride]
    when 0 <= wp - wo*stride < KW (and wp < Wp), else 0.
    """
    C_out, C_in, KH, KW = weight_oihw.shape
    Wp = W_in + 2 * padding
    W_out = (W_in + 2 * padding - KW) // stride + 1
    L = Wp * C_in
    Lp = _round_up(L, 128)

    w_hwio = jnp.transpose(weight_oihw, (2, 3, 1, 0))          # (KH, KW, C_in, C_out)
    wp_i = jnp.arange(Wp)[:, None, None]
    wo_i = jnp.arange(W_out)[None, :, None]
    kw_i = jnp.arange(KW)[None, None, :]
    sel = (wp_i == wo_i * stride + kw_i).astype(w_hwio.dtype)  # (Wp, W_out, KW)
    w_toep = jnp.einsum("pok,hkic->hpioc", sel, w_hwio)        # (KH,Wp,C_in,W_out,C_out)
    w_toep = w_toep.reshape(KH, L, W_out * C_out)
    if Lp != L:
        w_toep = jnp.pad(w_toep, ((0, 0), (0, Lp - L), (0, 0)))
    return w_toep.astype(dtype)                                # (KH, Lp, W_out*C_out)


def relu_conv_bn_forward(x_nchw, w_toep, *, stride, padding, C_out):
    """ReLU -> reflect-padded Conv2d (no bias) using a precomputed Toeplitz weight."""
    N, C_in, H, W = x_nchw.shape
    KH, Lp, Ncols = w_toep.shape
    W_out = Ncols // C_out
    H_out = (H + 2 * padding - KH) // stride + 1

    # ---- glue (jitted, layout only): NCHW -> NHWC, reflect pad, fold, align ----
    x = jnp.transpose(x_nchw, (0, 2, 3, 1))
    if padding > 0:
        x = jnp.pad(x, ((0, 0), (padding, padding), (padding, padding), (0, 0)),
                    mode="reflect")
    Hp, Wp = x.shape[1], x.shape[2]
    L = Wp * C_in
    assert _round_up(L, 128) == Lp, "weight was prepared for a different W/C_in"
    Hp_pad = _round_up(Hp, 8)
    x = x.reshape(N, Hp, L)
    # Single zero pad: sublane-align H (never read by kh slices) + lane-align L
    # (matched by zero Toeplitz rows).
    x = jnp.pad(x, ((0, 0), (0, Hp_pad - Hp), (0, Lp - L)))

    out = pl.pallas_call(
        functools.partial(_relu_conv_kernel, stride=stride),
        out_shape=jax.ShapeDtypeStruct((N, H_out, Ncols), jnp.float32),
        grid_spec=pltpu.PrefetchScalarGridSpec(
            num_scalar_prefetch=0,
            grid=(1,),  # single step: whole workload fits; batch folded into M
            in_specs=[
                pl.BlockSpec((N, Hp_pad, Lp), lambda i: (0, 0, 0)),
                pl.BlockSpec((KH, Lp, Ncols), lambda i: (0, 0, 0)),
            ],
            out_specs=pl.BlockSpec((N, H_out, Ncols), lambda i: (0, 0, 0)),
        ),
        compiler_params=pltpu.CompilerParams(
            dimension_semantics=("arbitrary",)),
    )(x, w_toep)

    # (N, H_out, W_out*C_out) -> NCHW to match the PyTorch output convention.
    out = out.reshape(N, H_out, W_out, C_out)
    return jnp.transpose(out, (0, 3, 1, 2))


if __name__ == "__main__":
    # Module config: ReLUConvBN(C_in=4, C_out=8, kernel_size=3, stride=1, padding=1)
    C_in, C_out, K, stride, padding = 4, 8, 3, 1, 1
    N, H, W = 2, 16, 16

    key = jax.random.PRNGKey(0)
    kx, kw = jax.random.split(key)
    x = jax.random.normal(kx, (N, C_in, H, W), dtype=jnp.float32)
    # Deterministic Kaiming-style init for the conv weight (bias=False).
    fan_in = C_in * K * K
    weight = jax.random.normal(kw, (C_out, C_in, K, K), dtype=jnp.float32) * (
        (2.0 / fan_in) ** 0.5)

    # Toeplitz expansion done ONCE per weight (module-init style), not per call.
    w_toep = jax.block_until_ready(
        prepare_toeplitz_weight(weight, W_in=W, stride=stride, padding=padding))

    fwd = jax.jit(functools.partial(relu_conv_bn_forward, stride=stride,
                                    padding=padding, C_out=C_out))
    out = jax.block_until_ready(fwd(x, w_toep))

    # Reference check against XLA conv on the reflect-padded ReLU'd input (f32).
    x_relu = jnp.maximum(x, 0.0)
    x_pad = jnp.pad(x_relu, ((0, 0), (0, 0), (padding, padding),
                             (padding, padding)), mode="reflect")
    ref = jax.lax.conv_general_dilated(
        x_pad, weight, window_strides=(stride, stride), padding=[(0, 0), (0, 0)],
        dimension_numbers=("NCHW", "OIHW", "NCHW"))
    assert out.shape == ref.shape == (N, C_out, H, W)
    # bf16 MXU operands with f32 accumulation -> loosened tolerance.
    assert jnp.max(jnp.abs(out - ref)) < 5e-2

    print("KERNEL_OK")
</pallas_src>

<mosaic_0001>
module attributes {stable_mosaic.version = 11 : i64} {
  func.func @_relu_conv_kernel(%arg0: i32, %arg1: memref<2x24x128xf32, #tpu.memory_space<vmem>>, %arg2: memref<3x128x128xbf16, #tpu.memory_space<vmem>>, %arg3: memref<2x16x128xf32, #tpu.memory_space<vmem>>) attributes {dimension_semantics = [#tpu.dimension_semantics<arbitrary>], iteration_bounds = array<i64: 1>, scalar_prefetch = 0 : i64, scratch_operands = 0 : i64, tpu.core_type = #tpu.core_type<tc>, window_params = [{pipeline_mode = #tpu.pipeline_mode<synchronous>, transform_indices = @transform_0, window_bounds = array<i64: 2, 24, 128>}, {pipeline_mode = #tpu.pipeline_mode<synchronous>, transform_indices = @transform_1, window_bounds = array<i64: 3, 128, 128>}, {pipeline_mode = #tpu.pipeline_mode<synchronous>, transform_indices = @transform_2, window_bounds = array<i64: 2, 16, 128>}]} {
    %cst = arith.constant 0.000000e+00 : f32
    %0 = vector.broadcast %cst : f32 to vector<32x128xf32>
    %c0 = arith.constant 0 : index
    %c0_0 = arith.constant 0 : index
    %c0_1 = arith.constant 0 : index
    %1 = vector.load %arg1[%c0, %c0_0, %c0_1] : memref<2x24x128xf32, #tpu.memory_space<vmem>>, vector<2x24x128xf32>
    %cst_2 = arith.constant 0.000000e+00 : f32
    %2 = vector.broadcast %cst_2 : f32 to vector<2x24x128xf32>
    %3 = arith.maximumf %1, %2 : vector<2x24x128xf32>
    %4 = vector.extract_strided_slice %3 {offsets = [0, 0, 0], sizes = [2, 16, 128], strides = [1, 1, 1]} : vector<2x24x128xf32> to vector<2x16x128xf32>
    %5 = vector.shape_cast %4 : vector<2x16x128xf32> to vector<32x128xf32>
    %6 = arith.truncf %5 : vector<32x128xf32> to vector<32x128xbf16>
    %c0_3 = arith.constant 0 : index
    %c0_4 = arith.constant 0 : index
    %c0_5 = arith.constant 0 : index
    %7 = vector.load %arg2[%c0_3, %c0_4, %c0_5] : memref<3x128x128xbf16, #tpu.memory_space<vmem>>, vector<1x128x128xbf16>
    %8 = vector.shape_cast %7 : vector<1x128x128xbf16> to vector<128x128xbf16>
    %cst_6 = arith.constant dense<0.000000e+00> : vector<32x128xf32>
    %9 = tpu.matmul %6, %8, %cst_6 {dimension_numbers = #tpu.dot_dimension_numbers<[1], [0], [0], [1], [0, 0, 1, 1], [], []>} : vector<32x128xbf16>, vector<128x128xbf16>, vector<32x128xf32> -> vector<32x128xf32>
    %10 = arith.addf %0, %9 : vector<32x128xf32>
    %11 = vector.extract_strided_slice %3 {offsets = [0, 1, 0], sizes = [2, 16, 128], strides = [1, 1, 1]} : vector<2x24x128xf32> to vector<2x16x128xf32>
    %12 = vector.shape_cast %11 : vector<2x16x128xf32> to vector<32x128xf32>
    %13 = arith.truncf %12 : vector<32x128xf32> to vector<32x128xbf16>
    %c1 = arith.constant 1 : index
    %c0_7 = arith.constant 0 : index
    %c0_8 = arith.constant 0 : index
    %14 = vector.load %arg2[%c1, %c0_7, %c0_8] : memref<3x128x128xbf16, #tpu.memory_space<vmem>>, vector<1x128x128xbf16>
    %15 = vector.shape_cast %14 : vector<1x128x128xbf16> to vector<128x128xbf16>
    %cst_9 = arith.constant dense<0.000000e+00> : vector<32x128xf32>
    %16 = tpu.matmul %13, %15, %cst_9 {dimension_numbers = #tpu.dot_dimension_numbers<[1], [0], [0], [1], [0, 0, 1, 1], [], []>} : vector<32x128xbf16>, vector<128x128xbf16>, vector<32x128xf32> -> vector<32x128xf32>
    %17 = arith.addf %10, %16 : vector<32x128xf32>
    %18 = vector.extract_strided_slice %3 {offsets = [0, 2, 0], sizes = [2, 16, 128], strides = [1, 1, 1]} : vector<2x24x128xf32> to vector<2x16x128xf32>
    %19 = vector.shape_cast %18 : vector<2x16x128xf32> to vector<32x128xf32>
    %20 = arith.truncf %19 : vector<32x128xf32> to vector<32x128xbf16>
    %c2 = arith.constant 2 : index
    %c0_10 = arith.constant 0 : index
    %c0_11 = arith.constant 0 : index
    %21 = vector.load %arg2[%c2, %c0_10, %c0_11] : memref<3x128x128xbf16, #tpu.memory_space<vmem>>, vector<1x128x128xbf16>
    %22 = vector.shape_cast %21 : vector<1x128x128xbf16> to vector<128x128xbf16>
    %cst_12 = arith.constant dense<0.000000e+00> : vector<32x128xf32>
    %23 = tpu.matmul %20, %22, %cst_12 {dimension_numbers = #tpu.dot_dimension_numbers<[1], [0], [0], [1], [0, 0, 1, 1], [], []>} : vector<32x128xbf16>, vector<128x128xbf16>, vector<32x128xf32> -> vector<32x128xf32>
    %24 = arith.addf %17, %23 : vector<32x128xf32>
    %25 = vector.shape_cast %24 : vector<32x128xf32> to vector<2x16x128xf32>
    %c0_13 = arith.constant 0 : index
    %c0_14 = arith.constant 0 : index
    %c0_15 = arith.constant 0 : index
    %26 = vector.load %arg3[%c0_13, %c0_14, %c0_15] : memref<2x16x128xf32, #tpu.memory_space<vmem>>, vector<2x16x128xf32>
    tpu.vector_store %arg3[%c0_13, %c0_14, %c0_15], %25 {strides = array<i32>} : memref<2x16x128xf32, #tpu.memory_space<vmem>>, vector<2x16x128xf32>,
    return
  }
  func.func @transform_0(%arg0: i32) -> (i32, i32, i32) {
    %c0_i32 = arith.constant 0 : i32
    %c0_i32_0 = arith.constant 0 : i32
    %c0_i32_1 = arith.constant 0 : i32
    %c0_i32_2 = arith.constant 0 : i32
    return %c0_i32, %c0_i32_0, %c0_i32_1 : i32, i32, i32
  }
  func.func @transform_1(%arg0: i32) -> (i32, i32, i32) {
    %c0_i32 = arith.constant 0 : i32
    %c0_i32_0 = arith.constant 0 : i32
    %c0_i32_1 = arith.constant 0 : i32
    %c0_i32_2 = arith.constant 0 : i32
    return %c0_i32, %c0_i32_0, %c0_i32_1 : i32, i32, i32
  }
  func.func @transform_2(%arg0: i32) -> (i32, i32, i32) {
    %c0_i32 = arith.constant 0 : i32
    %c0_i32_0 = arith.constant 0 : i32
    %c0_i32_1 = arith.constant 0 : i32
    %c0_i32_2 = arith.constant 0 : i32
    return %c0_i32, %c0_i32_0, %c0_i32_1 : i32, i32, i32
  }
}

</mosaic_0001>

<bundles_post_ra>
// kernel: relu_conv_bn_forward.1
= control target key start
LH: loop header
LB: loop body
LE: loop exit
PB: predicated region body
PF: predicated region fallthrough
CT: control target
= control target key end

     0   :  { %vm48_vm0 = vcmask 1046528   ;;  %vm276_vm1 = vcmask 1045504   ;;  %s722_s1 = inlined_call_operand.vmem [shape: bf16[3,128,128], index: 1, kind: input, shape index: {}]   ;;  %s723_s0 = inlined_call_operand.vmem [shape: f32[2,24,128], index: 0, kind: input, shape index: {}]   ;;  %s724_s2 = inlined_call_operand.vmem [shape: f32[2,16,128], index: 2, kind: output, shape index: {}]  }
   0x1   :  { %v573_v0 = vld [vmem:[%s722_s1] sm:$0xff]   ;;  %v574_v1 = vld [vmem:[%s722_s1 + $0x8] sm:$0xff]   ;;  %v575_v2 = vld [vmem:[%s722_s1 + $0x10] sm:$0xff]  }
   0x2   :  { %525 = vmatprep.subr.bf16.mxu0 %v573_v0  ;;  %v576_v3 = vld [vmem:[%s722_s1 + $0x18] sm:$0xff]   ;;  %v581_v4 = vld [vmem:[%s722_s1 + $0x40] sm:$0xff]   ;;  %v13_v6 = vld [vmem:[%s723_s0 + $0x8] sm:$0xff] }
   0x3   :  { %526 = vmatpush3.bf16.msra.mxu0 %v573_v0  ;;  %v12_v5 = vld [vmem:[%s723_s0] sm:$0xff]  ;;  %505 = vmatprep.subr.bf16.mxu1 %v581_v4  ;;  %v19_v8 = vmax.f32 %v13_v6, 0.0  ;;  %v583_v9 = vld [vmem:[%s722_s1 + $0x48] sm:$0xff]   ;;  %v585_v12 = vld [vmem:[%s722_s1 + $0x50] sm:$0xff]  }
   0x4   :  { %527 = vmatprep.subr.bf16.mxu0 %v574_v1  ;;  %v18_v7 = vmax.f32 %v12_v5, 0.0  ;;  %506 = vmatpush3.bf16.msra.mxu1 %v581_v4  ;;  %v577_v10 = vld [vmem:[%s722_s1 + $0x20] sm:$0xff]   ;;  %v578_v13 = vld [vmem:[%s722_s1 + $0x28] sm:$0xff]   ;;  %v587_v14 = vld [vmem:[%s722_s1 + $0x58] sm:$0xff]  }
   0x5   :  { %507 = vmatprep.subr.bf16.mxu1 %v583_v9  ;;  %v579_v15 = vld [vmem:[%s722_s1 + $0x30] sm:$0xff]   ;;  %v589_v16 = vld [vmem:[%s722_s1 + $0x60] sm:$0xff]   ;;  %v15_v17 = vld [vmem:[%s723_s0 + $0x18] sm:$0xff]  ;;  %v50_v21 = vrot.slane %v19_v8, 1  ;;  %v278_v26 = vrot.slane %v19_v8, 2 }
   0x6   :  { %v24_v11 = vpack.c.bf16 %v19_v8, %v18_v7  ;;  %v580_v18 = vld [vmem:[%s722_s1 + $0x38] sm:$0xff]   ;;  %v16_v19 = vld [vmem:[%s723_s0 + $0x20] sm:$0xff]  ;;  %v49_v20 = vrot.slane %v18_v7, 1  ;;  %v591_v22 = vld [vmem:[%s722_s1 + $0x68] sm:$0xff]   ;;  %v277_v25 = vrot.slane %v18_v7, 2  ;;  %v21_v27 = vmax.f32 %v15_v17, 0.0 }
   0x7   :  { %528 = vmatpush3.bf16.msra.mxu0 %v574_v1  ;;  %v14_v23 = vld [vmem:[%s723_s0 + $0x10] sm:$0xff]  ;;  %v22_v28 = vmax.f32 %v16_v19, 0.0  ;;  %v17_v29 = vld [vmem:[%s723_s0 + $0x28] sm:$0xff]  ;;  %v582_v34 = vld [vmem:[%s722_s1 + $0x80] sm:$0xff]  }
   0x8   :  { %529 = vmatprep.subr.bf16.mxu0 %v575_v2  ;;  %541 = vmatprep.mubr.bf16.mxu0 %v24_v11  ;;  %v20_v24 = vmax.f32 %v14_v23, 0.0  ;;  %v51_v30 = vsel %vm48_vm0, %v49_v20, %v50_v21  ;;  %v23_v32 = vmax.f32 %v17_v29, 0.0  ;;  %v593_v35 = vld [vmem:[%s722_s1 + $0x70] sm:$0xff]   ;;  %v279_v39 = vsel %vm276_vm1, %v277_v25, %v278_v26  ;;  %v584_v44 = vld [vmem:[%s722_s1 + $0x88] sm:$0xff]   ;;  %v595_v45 = vld [vmem:[%s722_s1 + $0x78] sm:$0xff]  }
   0x9   :  { %508 = vmatpush3.bf16.msra.mxu1 %v583_v9  ;;  %v25_v37 = vpack.c.bf16 %v22_v28, %v21_v27  ;;  %v54_v41 = vrot.slane %v21_v27, 1  ;;  %v55_v42 = vrot.slane %v22_v28, 1  ;;  %v586_v49 = vld [vmem:[%s722_s1 + $0x90] sm:$0xff]   ;;  %v588_v51 = vld [vmem:[%s722_s1 + $0x98] sm:$0xff]   ;;  %v590_v52 = vld [vmem:[%s722_s1 + $0xa0] sm:$0xff]   ;;  %v282_v55 = vrot.slane %v21_v27, 2 }
   0xa   :  { %509 = vmatprep.subr.bf16.mxu1 %v585_v12  ;;  %v52_v31 = vrot.slane %v20_v24, 1  ;;  %v280_v33 = vrot.slane %v20_v24, 2  ;;  %v57_v43 = vrot.slane %v23_v32, 1  ;;  %v592_v53 = vld [vmem:[%s722_s1 + $0xa8] sm:$0xff]   ;;  %v594_v54 = vld [vmem:[%s722_s1 + $0xb0] sm:$0xff]   ;;  %v283_v56 = vrot.slane %v22_v28, 2 }
   0xb   :  { %530 = vmatpush3.bf16.msra.mxu0 %v575_v2  ;;  %v56_v47 = vsel %vm48_vm0, %v54_v41, %v55_v42  ;;  %v285_v57 = vrot.slane %v23_v32, 2  ;;  %v596_v58 = vld [vmem:[%s722_s1 + $0xb8] sm:$0xff]  }
   0xc   :  { %531 = vmatprep.subr.bf16.mxu0 %v576_v3  ;;  %v53_v36 = vsel %vm48_vm0, %v50_v21, %v52_v31  ;;  %v281_v40 = vsel %vm276_vm1, %v278_v26, %v280_v33  ;;  %v58_v48 = vsel %vm48_vm0, %v55_v42, %v57_v43  ;;  %v284_v59 = vsel %vm276_vm1, %v282_v55, %v283_v56 }
   0xd   :  { %510 = vmatpush3.bf16.msra.mxu1 %v585_v12  ;;  %v63_v38 = vpack.c.bf16 %v53_v36, %v51_v30  ;;  %v291_v46 = vpack.c.bf16 %v281_v40, %v279_v39  ;;  %v64_v50 = vpack.c.bf16 %v58_v48, %v56_v47  ;;  %v286_v60 = vsel %vm276_vm1, %v283_v56, %v285_v57 }
   0xe   :  { %511 = vmatprep.subr.bf16.mxu1 %v587_v14  ;;  %v292_v61 = vpack.c.bf16 %v286_v60, %v284_v59 }
   0xf   :  { %532 = vmatpush3.bf16.msra.mxu0 %v576_v3  ;;  %521 = vmatprep.mubr.bf16.mxu1 %v63_v38 }
  0x10   :  { %533 = vmatprep.subr.bf16.mxu0 %v577_v10 }
  0x11   :  { %512 = vmatpush3.bf16.msra.mxu1 %v587_v14 }
  0x12   :  { %513 = vmatprep.subr.bf16.mxu1 %v589_v16 }
  0x13   :  { %534 = vmatpush3.bf16.msra.mxu0 %v577_v10 }
  0x14   :  { %535 = vmatprep.subr.bf16.mxu0 %v578_v13 }
  0x15   :  { %514 = vmatpush3.bf16.msra.mxu1 %v589_v16 }
  0x16   :  { %515 = vmatprep.subr.bf16.mxu1 %v591_v22 }
  0x17   :  { %536 = vmatpush3.bf16.msra.mxu0 %v578_v13 }
  0x18   :  { %537 = vmatprep.subr.bf16.mxu0 %v579_v15 }
  0x19   :  { %516 = vmatpush3.bf16.msra.mxu1 %v591_v22 }
  0x1a   :  { %517 = vmatprep.subr.bf16.mxu1 %v593_v35 }
  0x1b   :  { %538 = vmatpush3.bf16.msra.mxu0 %v579_v15 }
  0x1c   :  { %539 = vmatprep.subr.bf16.mxu0 %v580_v18 }
  0x1d   :  { %518 = vmatpush3.bf16.msra.mxu1 %v593_v35 }
  0x1e   :  { %519 = vmatprep.subr.bf16.mxu1 %v595_v45 }
  0x1f   :  { %540 = vmatpush3.bf16.msra.mxu0 %v580_v18 }
  0x20   :  { %545 = vmatprep.subr.bf16.mxu0 %v582_v34 }
  0x21   :  { %520 = vmatpush3.bf16.msra.mxu1 %v595_v45 }
  0x22   :  { %542 = vmatmul.mubr.bf16.vlgmr.msra.gmra.mrb[0].mxu0 %v25_v37 }
  0x23   :  { %546 = vmatpush3.bf16.msra.mxu0 %v582_v34  ;;  %561 = vmatprep.mubr.bf16.mxu0 %v291_v46 }
  0x24   :  { %547 = vmatprep.subr.bf16.mxu0 %v584_v44  ;;  %522 = vmatmul.mubr.bf16.vlgmr.msra.gmra.mrb[0].mxu1 %v64_v50 }
  0x27   :  { %548 = vmatpush3.bf16.msra.mxu0 %v584_v44 }
  0x28   :  { %549 = vmatprep.subr.bf16.mxu0 %v586_v49 }
  0x2b   :  { %550 = vmatpush3.bf16.msra.mxu0 %v586_v49 }
  0x2c   :  { %551 = vmatprep.subr.bf16.mxu0 %v588_v51 }
  0x2f   :  { %552 = vmatpush3.bf16.msra.mxu0 %v588_v51 }
  0x30   :  { %553 = vmatprep.subr.bf16.mxu0 %v590_v52 }
  0x33   :  { %554 = vmatpush3.bf16.msra.mxu0 %v590_v52 }
  0x34   :  { %555 = vmatprep.subr.bf16.mxu0 %v592_v53 }
  0x37   :  { %556 = vmatpush3.bf16.msra.mxu0 %v592_v53 }
  0x38   :  { %557 = vmatprep.subr.bf16.mxu0 %v594_v54 }
  0x3b   :  { %558 = vmatpush3.bf16.msra.mxu0 %v594_v54 }
  0x3c   :  { %559 = vmatprep.subr.bf16.mxu0 %v596_v58 }
  0x3f   :  { %560 = vmatpush3.bf16.msra.mxu0 %v596_v58 }
  0x42   :  { %562 = vmatmul.mubr.bf16.vlgmr.msra.gmra.mrb[0].mxu0 %v292_v61 }
  0xf7   :  { %v523_v62 = vpop.f32.mrb[0].mxu1 }
  0xf8   :  { %v164_v63 = vpop.f32.mrb[1].mxu1 }
  0xf9   :  { %v524_v0 = vpop.f32.mrb[2].mxu1 }
  0xfa   :  { %v167_v1 = vpop.f32.mrb[3].mxu1 }
 0x115   :  { %v563_v2 = vpop.f32.mrb[0].mxu0 }
 0x116   :  { %v565_v3 = vadd.f32 %v563_v2, %v523_v62  ;;  %v392_v4 = vpop.f32.mrb[1].mxu0 }
 0x117   :  { %v566_v5 = vadd.f32 %v392_v4, %v164_v63  ;;  %v564_v6 = vpop.f32.mrb[2].mxu0 }
 0x118   :  { %413 = vst [vmem:[%s724_s2 + $0x10] sm:$0xff] %v565_v3  ;;  %v567_v7 = vadd.f32 %v564_v6, %v524_v0  ;;  %v395_v8 = vpop.f32.mrb[3].mxu0 }
 0x119   :  { %411 = vst [vmem:[%s724_s2] sm:$0xff] %v566_v5  ;;  %v568_v9 = vadd.f32 %v395_v8, %v167_v1 }
 0x11a   :  { %414 = vst [vmem:[%s724_s2 + $0x18] sm:$0xff] %v567_v7 }
 0x11b   :  { %412 = vst [vmem:[%s724_s2 + $0x8] sm:$0xff] %v568_v9 }

</bundles_post_ra>
